<compile_context>
chip_gen: v5e
topology: v5e:2x2
jax: 0.10.0
libtpu: 0.0.40
codegen_flags: <defaults>
</compile_context>

<pallas_src>
import functools

import jax
import jax.numpy as jnp
from jax.experimental import pallas as pl
from jax.experimental.pallas import tpu as pltpu

IGNORE_INDEX = -100.0
SMOOTH_FACTOR = 0.1

_LANES = 128            # lane dim of the flattened 2-D view
_MAX_BLOCK_ROWS = 2048  # 2048 x 128 f32 = 1 MiB per input block per buffer


def _round_up(v, m):
    return (v + m - 1) // m * m


def _elementwise_loss(x, t):
    """Stable BCE-with-logits + label smoothing + ignore mask (all f32)."""
    soft_t = (1.0 - t) * SMOOTH_FACTOR + t * (1.0 - SMOOTH_FACTOR)
    # softplus(x) = max(x, 0) + log1p(exp(-|x|))  (numerically stable)
    softplus_x = jnp.maximum(x, 0.0) + jnp.log1p(jnp.exp(-jnp.abs(x)))
    loss = softplus_x - x * soft_t
    mask = (t != IGNORE_INDEX).astype(jnp.float32)
    return loss * mask


def _soft_bce_partial_sum_kernel(x_ref, t_ref, part_ref, *,
                                 rows_total, block_rows, need_row_mask):
    """Each grid step writes an (1, 8, 128) partial sum of its block."""
    x = x_ref[...].astype(jnp.float32)
    t = t_ref[...].astype(jnp.float32)
    loss = _elementwise_loss(x, t)
    if need_row_mask:
        # Ragged last block: rows beyond the real array hold unspecified data.
        row_ids = (pl.program_id(0) * block_rows
                   + jax.lax.broadcasted_iota(jnp.int32, loss.shape, 0))
        loss = jnp.where(row_ids < rows_total, loss, 0.0)
    # Tile-aligned regroup (block_rows, 128) -> (block_rows//8, 8, 128) and
    # reduce over the major axis: pure vreg adds on the VPU, no XLU, no
    # serial SMEM read-modify-write across the grid.
    part = jnp.sum(loss.reshape(block_rows // 8, 8, _LANES),
                   axis=0, keepdims=True)
    part_ref[...] = part


def _soft_bce_elem_kernel(x_ref, t_ref, o_ref):
    """Writes masked per-element loss (for reduction='none') in o_ref.dtype."""
    x = x_ref[...].astype(jnp.float32)
    t = t_ref[...].astype(jnp.float32)
    o_ref[...] = _elementwise_loss(x, t).astype(o_ref.dtype)


@functools.partial(jax.jit, static_argnames=("reduction",))
def soft_bce_with_logits_loss(logits, target, reduction="mean"):
    """Pallas implementation of SoftBCEWithLogitsLoss.forward.

    logits, target: same shape (e.g. NCHW). weight=None, pos_weight=None.
    """
    orig_shape = logits.shape
    out_dtype = logits.dtype
    n = logits.size

    x_flat = logits.reshape(-1)
    t_flat = target.reshape(-1)
    pad = (-n) % _LANES
    if pad:
        # TODO(synk): rare n % 128 != 0 case pads (extra copy); the common
        # aligned case below is a copy-free bitcast reshape.
        x_flat = jnp.pad(x_flat, (0, pad))
        t_flat = jnp.pad(t_flat, (0, pad), constant_values=IGNORE_INDEX)

    rows = (n + pad) // _LANES
    x2 = x_flat.reshape(rows, _LANES)
    t2 = t_flat.reshape(rows, _LANES)

    block_rows = min(_MAX_BLOCK_ROWS, _round_up(rows, 8))
    num_blocks = pl.cdiv(rows, block_rows)
    need_row_mask = (rows % block_rows) != 0

    in_specs = [
        pl.BlockSpec((block_rows, _LANES), lambda i: (i, 0)),
        pl.BlockSpec((block_rows, _LANES), lambda i: (i, 0)),
    ]

    if reduction in ("mean", "sum"):
        kernel = functools.partial(
            _soft_bce_partial_sum_kernel,
            rows_total=rows,
            block_rows=block_rows,
            need_row_mask=need_row_mask,
        )
        partials = pl.pallas_call(
            kernel,
            out_shape=jax.ShapeDtypeStruct((num_blocks, 8, _LANES), jnp.float32),
            grid_spec=pltpu.PrefetchScalarGridSpec(
                num_scalar_prefetch=0,
                grid=(num_blocks,),
                in_specs=in_specs,
                out_specs=pl.BlockSpec((1, 8, _LANES), lambda i: (i, 0, 0)),
            ),
            compiler_params=pltpu.CompilerParams(
                dimension_semantics=("parallel",),
            ),
        )(x2, t2)
        total = jnp.sum(partials)  # tiny final reduce in the wrapper
        if reduction == "mean":
            # PyTorch divides by the TOTAL element count (ignored elems included).
            total = total / jnp.float32(n)
        return total.astype(out_dtype)

    # reduction == 'none': elementwise loss, same shape & dtype as input.
    loss2 = pl.pallas_call(
        _soft_bce_elem_kernel,
        out_shape=jax.ShapeDtypeStruct((rows, _LANES), out_dtype),
        grid_spec=pltpu.PrefetchScalarGridSpec(
            num_scalar_prefetch=0,
            grid=(num_blocks,),
            in_specs=in_specs,
            out_specs=pl.BlockSpec((block_rows, _LANES), lambda i: (i, 0)),
        ),
        compiler_params=pltpu.CompilerParams(
            dimension_semantics=("parallel",),
        ),
    )(x2, t2)
    flat = loss2.reshape(-1)
    if pad:
        flat = flat[:n]
    return flat.reshape(orig_shape)


def _reference(logits, target, reduction="mean"):
    """Pure-JAX reference mirroring the PyTorch module."""
    x = logits.astype(jnp.float32)
    t = target.astype(jnp.float32)
    soft_t = (1.0 - t) * SMOOTH_FACTOR + t * (1.0 - SMOOTH_FACTOR)
    loss = jnp.maximum(x, 0.0) + jnp.log1p(jnp.exp(-jnp.abs(x))) - x * soft_t
    loss = loss * (t != IGNORE_INDEX).astype(jnp.float32)
    if reduction == "mean":
        return loss.mean()
    if reduction == "sum":
        return loss.sum()
    return loss


if __name__ == "__main__":
    key = jax.random.PRNGKey(0)
    k1, k2, k3, k4 = jax.random.split(key, 4)

    # Primary case: NCHW, lane-aligned (n % 128 == 0) — no padding copies.
    N, C, H, W = 2, 4, 16, 16
    logits = jax.random.normal(k1, (N, C, H, W), dtype=jnp.float32)
    target = jax.random.bernoulli(k2, 0.5, (N, C, H, W)).astype(jnp.float32)
    target = target.at[0, 0, 0, :4].set(IGNORE_INDEX)
    target = target.at[1, 2, 5, 7].set(IGNORE_INDEX)

    for red in ("mean", "sum", "none"):
        out = jax.block_until_ready(
            soft_bce_with_logits_loss(logits, target, reduction=red))
        ref = _reference(logits, target, reduction=red)
        assert jnp.allclose(out, ref, rtol=1e-5, atol=1e-6), (red, out, ref)

    # Ragged case: exercises pad + in-kernel row masking on the edge block.
    shape2 = (3, 5, 7, 11)  # 1155 elements, not a multiple of 128
    logits2 = jax.random.normal(k3, shape2, dtype=jnp.float32)
    target2 = jax.random.bernoulli(k4, 0.5, shape2).astype(jnp.float32)
    target2 = target2.at[0, 0, 0, 0].set(IGNORE_INDEX)

    for red in ("mean", "sum", "none"):
        out = jax.block_until_ready(
            soft_bce_with_logits_loss(logits2, target2, reduction=red))
        ref = _reference(logits2, target2, reduction=red)
        assert jnp.allclose(out, ref, rtol=1e-5, atol=1e-6), (red, out, ref)

    print("KERNEL_OK")
</pallas_src>

<mosaic_0001>
module attributes {stable_mosaic.version = 11 : i64} {
  func.func @_soft_bce_partial_sum_kernel(%arg0: i32, %arg1: memref<16x128xf32, #tpu.memory_space<vmem>>, %arg2: memref<16x128xf32, #tpu.memory_space<vmem>>, %arg3: memref<1x8x128xf32, #tpu.memory_space<vmem>>) attributes {dimension_semantics = [#tpu.dimension_semantics<parallel>], iteration_bounds = array<i64: 1>, scalar_prefetch = 0 : i64, scratch_operands = 0 : i64, tpu.core_type = #tpu.core_type<tc>, window_params = [{transform_indices = @transform_0, window_bounds = array<i64: 16, 128>}, {transform_indices = @transform_1, window_bounds = array<i64: 16, 128>}, {transform_indices = @transform_2, window_bounds = array<i64: 1, 8, 128>}]} {
    %c0 = arith.constant 0 : index
    %c0_0 = arith.constant 0 : index
    %0 = vector.load %arg1[%c0, %c0_0] : memref<16x128xf32, #tpu.memory_space<vmem>>, vector<16x128xf32>
    %c0_1 = arith.constant 0 : index
    %c0_2 = arith.constant 0 : index
    %1 = vector.load %arg2[%c0_1, %c0_2] : memref<16x128xf32, #tpu.memory_space<vmem>>, vector<16x128xf32>
    %cst = arith.constant 1.000000e+00 : f32
    %2 = vector.broadcast %cst : f32 to vector<16x128xf32>
    %3 = arith.subf %2, %1 : vector<16x128xf32>
    %cst_3 = arith.constant 1.000000e-01 : f32
    %4 = vector.broadcast %cst_3 : f32 to vector<16x128xf32>
    %5 = arith.mulf %3, %4 : vector<16x128xf32>
    %cst_4 = arith.constant 0.899999976 : f32
    %6 = vector.broadcast %cst_4 : f32 to vector<16x128xf32>
    %7 = arith.mulf %1, %6 : vector<16x128xf32>
    %8 = arith.addf %5, %7 : vector<16x128xf32>
    %cst_5 = arith.constant 0.000000e+00 : f32
    %9 = vector.broadcast %cst_5 : f32 to vector<16x128xf32>
    %10 = arith.maximumf %0, %9 : vector<16x128xf32>
    %11 = math.absf %0 : vector<16x128xf32>
    %cst_6 = arith.constant 0.000000e+00 : f32
    %12 = vector.broadcast %cst_6 : f32 to vector<16x128xf32>
    %13 = arith.subf %12, %11 : vector<16x128xf32>
    %14 = math.exp %13 : vector<16x128xf32>
    %15 = math.log1p %14 : vector<16x128xf32>
    %16 = arith.addf %10, %15 : vector<16x128xf32>
    %17 = arith.mulf %0, %8 : vector<16x128xf32>
    %18 = arith.subf %16, %17 : vector<16x128xf32>
    %cst_7 = arith.constant -1.000000e+02 : f32
    %19 = vector.broadcast %cst_7 : f32 to vector<16x128xf32>
    %20 = arith.cmpf one, %1, %19 : vector<16x128xf32>
    %21 = arith.extui %20 : vector<16x128xi1> to vector<16x128xi32>
    %22 = arith.sitofp %21 : vector<16x128xi32> to vector<16x128xf32>
    %23 = arith.mulf %18, %22 : vector<16x128xf32>
    %24 = vector.shape_cast %23 : vector<16x128xf32> to vector<2x8x128xf32>
    %cst_8 = arith.constant dense<0.000000e+00> : vector<8x128xf32>
    %25 = vector.multi_reduction <add>, %24, %cst_8 [0] : vector<2x8x128xf32> to vector<8x128xf32>
    %26 = vector.shape_cast %25 : vector<8x128xf32> to vector<1x8x128xf32>
    %c0_9 = arith.constant 0 : index
    %c0_10 = arith.constant 0 : index
    %c0_11 = arith.constant 0 : index
    %27 = vector.load %arg3[%c0_9, %c0_10, %c0_11] : memref<1x8x128xf32, #tpu.memory_space<vmem>>, vector<1x8x128xf32>
    tpu.vector_store %arg3[%c0_9, %c0_10, %c0_11], %26 {strides = array<i32>} : memref<1x8x128xf32, #tpu.memory_space<vmem>>, vector<1x8x128xf32>,
    return
  }
  func.func @transform_0(%arg0: i32) -> (i32, i32) {
    %c0_i32 = arith.constant 0 : i32
    %c0_i32_0 = arith.constant 0 : i32
    return %arg0, %c0_i32 : i32, i32
  }
  func.func @transform_1(%arg0: i32) -> (i32, i32) {
    %c0_i32 = arith.constant 0 : i32
    %c0_i32_0 = arith.constant 0 : i32
    return %arg0, %c0_i32 : i32, i32
  }
  func.func @transform_2(%arg0: i32) -> (i32, i32, i32) {
    %c0_i32 = arith.constant 0 : i32
    %c0_i32_0 = arith.constant 0 : i32
    %c0_i32_1 = arith.constant 0 : i32
    return %arg0, %c0_i32, %c0_i32_0 : i32, i32, i32
  }
}

</mosaic_0001>

<bundles_post_ra>
// kernel: soft_bce_with_logits_loss.1
= control target key start
LH: loop header
LB: loop body
LE: loop exit
PB: predicated region body
PF: predicated region fallthrough
CT: control target
= control target key end

     0   :  { %v82_v42 = vmov 0.0   ;;  %s113_s0 = inlined_call_operand.vmem [shape: f32[16,128], index: 0, kind: input, shape index: {}]   ;;  %s114_s1 = inlined_call_operand.vmem [shape: f32[16,128], index: 1, kind: input, shape index: {}]   ;;  %s115_s2 = inlined_call_operand.vmem [shape: f32[1,8,128], index: 2, kind: output, shape index: {}]  }
   0x1   :  { %v11_v0 = vld [vmem:[%s113_s0] sm:$0xff]  ;;  %v12_v1 = vld [vmem:[%s113_s0 + $0x8] sm:$0xff] }
   0x2   :  { %v25_v2 = vand.u32 2147483647, %v11_v0  ;;  %v26_v3 = vand.u32 2147483647, %v12_v1  ;;  %v13_v8 = vld [vmem:[%s114_s1] sm:$0xff]  ;;  %v14_v9 = vld [vmem:[%s114_s1 + $0x8] sm:$0xff] }
   0x3   :  { %v15_v10 = vsub.f32 1.0, %v13_v8  ;;  %v16_v12 = vsub.f32 1.0, %v14_v9  ;;  %v19_v19 = vmul.f32 0.9, %v13_v8  ;;  %v20_v21 = vmul.f32 0.9, %v14_v9 }
   0x4   :  { %v27_v4 = vsub.f32 0.0, %v25_v2  ;;  %v28_v5 = vsub.f32 0.0, %v26_v3  ;;  %v23_v30 = vmax.f32 %v11_v0, 0.0  ;;  %v24_v33 = vmax.f32 %v12_v1, 0.0 }
   0x5   :  { %v17_v18 = vmul.f32 0.1, %v15_v10  ;;  %v18_v20 = vmul.f32 0.1, %v16_v12  ;;  %vm57_vm2 = vcmp.ne.f32.partialorder %v13_v8, -100.0  ;;  %vm58_vm3 = vcmp.ne.f32.partialorder %v14_v9, -100.0 }
   0x6   :  { %v29_v6 = vmul.f32 1.442695, %v27_v4  ;;  %v31_v7 = vmul.f32 1.442695, %v28_v5  ;;  %v71_v43 = vsel %vm57_vm2, 1.0, %v82_v42  ;;  %v72_v45 = vsel %vm58_vm3, 1.0, %v82_v42 }
   0x7   :  { %v21_v26 = vadd.f32 %v19_v19, %v17_v18  ;;  %v22_v27 = vadd.f32 %v20_v21, %v18_v20 }
   0x8   :  { %74 = vpow2.f32 %v29_v6 }
   0x9   :  { %76 = vpow2.f32 %v31_v7  ;;  %v53_v36 = vmul.f32 %v21_v26, %v11_v0  ;;  %v54_v38 = vmul.f32 %v22_v27, %v12_v1 }
   0xe   :  { %v75_v11 = vpop.eup %74 }
   0xf   :  { %v77_v13 = vpop.eup %76  ;;  %v33_v14 = vadd.f32 1.0, %v75_v11  ;;  %v36_v15 = vmul.f32 -0.5, %v75_v11  ;;  %v39_v23 = vand.u32 2147483647, %v75_v11 }
  0x10   :  { %v42_v16 = vadd.f32 1.0, %v77_v13  ;;  %v45_v17 = vmul.f32 -0.5, %v77_v13  ;;  %v48_v25 = vand.u32 2147483647, %v77_v13 }
  0x11   :  { %78 = vlog2.f32 %v33_v14  ;;  %v37_v22 = vadd.f32 1.0, %v36_v15  ;;  %vm40_vm0 = vcmp.lt.f32.partialorder %v39_v23, 0.0004427343 }
  0x12   :  { %80 = vlog2.f32 %v42_v16  ;;  %v46_v24 = vadd.f32 1.0, %v45_v17  ;;  %vm49_vm1 = vcmp.lt.f32.partialorder %v48_v25, 0.0004427343 }
  0x13   :  { %v38_v28 = vmul.f32 %v75_v11, %v37_v22 }
  0x14   :  { %v47_v31 = vmul.f32 %v77_v13, %v46_v24 }
  0x17   :  { %v79_v29 = vpop.eup %78 }
  0x18   :  { %v81_v32 = vpop.eup %80  ;;  %v35_v34 = vmul.f32 0.6931472, %v79_v29 }
  0x19   :  { %v44_v35 = vmul.f32 0.6931472, %v81_v32 }
  0x1a   :  { %v41_v37 = vsel %vm40_vm0, %v38_v28, %v35_v34 }
  0x1b   :  { %v50_v39 = vsel %vm49_vm1, %v47_v31, %v44_v35  ;;  %v51_v40 = vadd.f32 %v41_v37, %v23_v30 }
  0x1c   :  { %v52_v41 = vadd.f32 %v50_v39, %v24_v33 }
  0x1d   :  { %v55_v44 = vsub.f32 %v51_v40, %v53_v36 }
  0x1e   :  { %v56_v46 = vsub.f32 %v52_v41, %v54_v38 }
  0x1f   :  { %v63_v47 = vmul.f32 %v71_v43, %v55_v44 }
  0x20   :  { %v64_v48 = vmul.f32 %v72_v45, %v56_v46 }
  0x22   :  { %v65_v49 = vadd.f32 %v64_v48, %v63_v47 }
  0x24   :  { %66 = vst [vmem:[%s115_s2] sm:$0xff] %v65_v49 }

</bundles_post_ra>
